<compile_context>
chip_gen: v6e
topology: v6e:2x2x1
jax: 0.10.0
libtpu: 0.0.40
codegen_flags: <defaults>
</compile_context>

<pallas_src>
import jax
import jax.numpy as jnp
from jax import lax
from jax.experimental import pallas as pl
from jax.experimental.pallas import tpu as pltpu

INPUT_SIZE = 2
HIDDEN_SIZE = 32
NUM_LAYERS = 2
NUM_DIRS = 2


# ----------------------------------------------------------------------------
# Fused Pallas kernel: 2-layer bidirectional tanh-RNN + Linear + ReLU
# ----------------------------------------------------------------------------
def _fused_birnn_kernel(x_ref, h0_ref,
                        wih0_ref, whh0_ref, b0_ref,
                        wih1_ref, whh1_ref, b1_ref,
                        fcw_ref, fcb_ref,
                        y_ref, hn_ref):
    """Whole forward pass in one kernel.

    x_ref  : (T, B, I)   time-major input
    h0_ref : (L, B, 2H)  initial hidden, per layer lane-packed [fwd | bwd]
    wih{l} : (F, 2H)     [W_ih_f^T | W_ih_b^T]           (F = I or 2H)
    whh{l} : (2H, 2H)    block-diag(W_hh_f^T, W_hh_b^T)
    b{l}   : (1, 2H)     [b_ih_f+b_hh_f | b_ih_b+b_hh_b]
    fcw    : (2H, I)     fc.weight^T ;  fcb: (1, I)
    y_ref  : (T, B, I)   output (time-major; wrapper transposes to batch_first)
    hn_ref : (4, B, H)   final hidden states, PyTorch order [l0_f, l0_b, l1_f, l1_b]
    """
    T, B, _ = x_ref.shape
    H2 = whh0_ref.shape[0]
    H = H2 // 2

    def mm(a, b):
        return jnp.dot(a, b, preferred_element_type=jnp.float32)

    # Lane mask selecting the forward (left) half of a direction-packed value.
    lane = lax.broadcasted_iota(jnp.int32, (B, H2), 1)
    left = lane < H

    def run_layer(proj, whh, h0):
        # proj[t]: (B, 2H) hoisted input projection, packed [fwd_t | bwd_t].
        # At step s the forward half consumes time s, the backward half
        # consumes time T-1-s -> pure VPU select, no data movement.
        carry = h0
        states = [None] * T
        for s in range(T):                     # fully unrolled; carries in vregs
            p = jnp.where(left, proj[s], proj[T - 1 - s])
            carry = jnp.tanh(p + mm(carry, whh))   # ONE block-diag matmul / step
            states[s] = carry
        return states, carry

    # ---------------- layer 0 ----------------
    wih0 = wih0_ref[...]
    b0 = b0_ref[...]
    proj0 = [mm(x_ref[t], wih0) + b0 for t in range(T)]     # hoisted off the chain
    states0, last0 = run_layer(proj0, whh0_ref[...], h0_ref[0])
    hn_ref[0] = last0[:, 0:H]
    hn_ref[1] = last0[:, H:H2]
    # TODO(synk): nn.RNN dropout=0.4 between layers is training-only and
    # stochastic; eval/inference semantics (identity) are implemented here.

    # Layer-0 output at time t, both directions packed: [fwd0_t | bwd0_t].
    out0 = [jnp.where(left, states0[t], states0[T - 1 - t]) for t in range(T)]

    # ---------------- layer 1 ----------------
    wih1 = wih1_ref[...]
    b1 = b1_ref[...]
    proj1 = [mm(out0[t], wih1) + b1 for t in range(T)]
    states1, last1 = run_layer(proj1, whh1_ref[...], h0_ref[1])
    hn_ref[2] = last1[:, 0:H]
    hn_ref[3] = last1[:, H:H2]

    out1 = [jnp.where(left, states1[t], states1[T - 1 - t]) for t in range(T)]

    # ---------------- fc + relu ----------------
    fcw = fcw_ref[...]
    fcb = fcb_ref[...]
    for t in range(T):
        y_ref[t] = jnp.maximum(mm(out1[t], fcw) + fcb, 0.0)


# ----------------------------------------------------------------------------
# Parameters (deterministic init, PyTorch-style U(-1/sqrt(H), 1/sqrt(H)))
# ----------------------------------------------------------------------------
def init_params(key, input_size=INPUT_SIZE, hidden_size=HIDDEN_SIZE):
    params = {"rnn": {}}
    k = 1.0 / float(hidden_size) ** 0.5
    for layer in range(NUM_LAYERS):
        in_sz = input_size if layer == 0 else hidden_size * NUM_DIRS
        for d in range(NUM_DIRS):
            key, k1, k2, k3, k4 = jax.random.split(key, 5)
            params["rnn"][(layer, d)] = dict(
                w_ih=jax.random.uniform(k1, (hidden_size, in_sz), jnp.float32, -k, k),
                w_hh=jax.random.uniform(k2, (hidden_size, hidden_size), jnp.float32, -k, k),
                b_ih=jax.random.uniform(k3, (hidden_size,), jnp.float32, -k, k),
                b_hh=jax.random.uniform(k4, (hidden_size,), jnp.float32, -k, k),
            )
    kf = 1.0 / float(hidden_size * 2) ** 0.5
    key, k1, k2 = jax.random.split(key, 3)
    params["fc_w"] = jax.random.uniform(k1, (input_size, hidden_size * 2), jnp.float32, -kf, kf)
    params["fc_b"] = jax.random.uniform(k2, (input_size,), jnp.float32, -kf, kf)
    return params


def pack_params(params, hidden_size=HIDDEN_SIZE):
    """One-time packing into kernel-ready layouts (transpose + concat + bias fold)."""
    H = hidden_size
    pk = {}
    for layer in range(NUM_LAYERS):
        f = params["rnn"][(layer, 0)]
        b = params["rnn"][(layer, 1)]
        # input->hidden, both directions lane-concatenated: (F, 2H)
        pk[f"wih{layer}"] = jnp.concatenate(
            [f["w_ih"].T, b["w_ih"].T], axis=1).astype(jnp.float32)
        # hidden->hidden block-diagonal: (2H, 2H)
        whh = jnp.zeros((2 * H, 2 * H), jnp.float32)
        whh = whh.at[:H, :H].set(f["w_hh"].T).at[H:, H:].set(b["w_hh"].T)
        pk[f"whh{layer}"] = whh
        # biases folded and lane-concatenated: (1, 2H)
        pk[f"b{layer}"] = jnp.concatenate(
            [f["b_ih"] + f["b_hh"], b["b_ih"] + b["b_hh"]])[None, :].astype(jnp.float32)
    pk["fc_w"] = jnp.asarray(params["fc_w"].T, jnp.float32)     # (2H, I)
    pk["fc_b"] = jnp.asarray(params["fc_b"][None, :], jnp.float32)  # (1, I)
    return pk


# ----------------------------------------------------------------------------
# Model forward: one fused pallas_call
# ----------------------------------------------------------------------------
def rnn_model_forward(packed, x, h=None, hidden_size=HIDDEN_SIZE):
    """x: (B, T, I) batch_first. Returns (y, h_n): y (B, T, I), h_n (4, B, H)."""
    B, T, I = x.shape
    H = hidden_size
    if h is None:
        h = jnp.zeros((NUM_LAYERS * NUM_DIRS, B, H), jnp.float32)

    x_tm = jnp.transpose(x, (1, 0, 2))                              # (T, B, I)
    # Per-layer lane-packed initial hidden: (L, B, 2H) = [fwd | bwd]
    h0p = jnp.transpose(h.reshape(NUM_LAYERS, NUM_DIRS, B, H),
                        (0, 2, 1, 3)).reshape(NUM_LAYERS, B, NUM_DIRS * H)

    operands = (
        x_tm, h0p,
        packed["wih0"], packed["whh0"], packed["b0"],
        packed["wih1"], packed["whh1"], packed["b1"],
        packed["fc_w"], packed["fc_b"],
    )
    vmem = pl.BlockSpec(memory_space=pltpu.MemorySpace.VMEM)
    y_tm, h_n = pl.pallas_call(
        _fused_birnn_kernel,
        out_shape=(jax.ShapeDtypeStruct((T, B, I), jnp.float32),
                   jax.ShapeDtypeStruct((NUM_LAYERS * NUM_DIRS, B, H), jnp.float32)),
        in_specs=[vmem] * len(operands),
        out_specs=(vmem, vmem),
    )(*operands)
    return jnp.transpose(y_tm, (1, 0, 2)), h_n


# ----------------------------------------------------------------------------
# Pure-JAX reference (for numeric verification of the Pallas kernel)
# ----------------------------------------------------------------------------
def ref_forward(params, x, h=None, hidden_size=HIDDEN_SIZE):
    B, T, I = x.shape
    H = hidden_size
    if h is None:
        h = jnp.zeros((NUM_LAYERS * NUM_DIRS, B, H), jnp.float32)

    def run_dir(x_tm, p, h0):
        def step(hprev, xt):
            hnew = jnp.tanh(xt @ p["w_ih"].T + p["b_ih"] + hprev @ p["w_hh"].T + p["b_hh"])
            return hnew, hnew
        hN, ys = lax.scan(step, h0, x_tm)
        return ys, hN

    layer_in = jnp.transpose(x, (1, 0, 2))
    h_finals = []
    for layer in range(NUM_LAYERS):
        outs = []
        for d in range(NUM_DIRS):
            p = params["rnn"][(layer, d)]
            xin = layer_in if d == 0 else layer_in[::-1]
            y_dir, hN = run_dir(xin, p, h[layer * NUM_DIRS + d])
            if d == 1:
                y_dir = y_dir[::-1]
            outs.append(y_dir)
            h_finals.append(hN)
        layer_in = jnp.concatenate(outs, axis=-1)
    h_n = jnp.stack(h_finals, axis=0)
    y = jnp.transpose(layer_in, (1, 0, 2))
    o = jnp.maximum(y @ params["fc_w"].T + params["fc_b"], 0.0)
    return o, h_n


if __name__ == "__main__":
    key = jax.random.PRNGKey(0)
    params = init_params(key)
    packed = pack_params(params)

    # Same input as the PyTorch script: arange(5*3*2).view(5, 3, 2), batch_first.
    x = jnp.arange(5 * 3 * 2, dtype=jnp.float32).reshape(5, 3, 2)

    fwd = jax.jit(rnn_model_forward)
    y, h_n = fwd(packed, x)
    jax.block_until_ready((y, h_n))

    y_ref, h_ref = ref_forward(params, x)
    assert y.shape == (5, 3, INPUT_SIZE)
    assert h_n.shape == (NUM_LAYERS * NUM_DIRS, 5, HIDDEN_SIZE)
    assert jnp.allclose(y, y_ref, atol=1e-5, rtol=1e-5)
    assert jnp.allclose(h_n, h_ref, atol=1e-5, rtol=1e-5)

    print("KERNEL_OK")
</pallas_src>

<mosaic_0001>
module attributes {stable_mosaic.version = 11 : i64} {
  func.func @_fused_birnn_kernel(%arg0: memref<3x5x2xf32, #tpu.memory_space<vmem>>, %arg1: memref<2x5x64xf32, #tpu.memory_space<vmem>>, %arg2: memref<2x64xf32, #tpu.memory_space<vmem>>, %arg3: memref<64x64xf32, #tpu.memory_space<vmem>>, %arg4: memref<1x64xf32, #tpu.memory_space<vmem>>, %arg5: memref<64x64xf32, #tpu.memory_space<vmem>>, %arg6: memref<64x64xf32, #tpu.memory_space<vmem>>, %arg7: memref<1x64xf32, #tpu.memory_space<vmem>>, %arg8: memref<64x2xf32, #tpu.memory_space<vmem>>, %arg9: memref<1x2xf32, #tpu.memory_space<vmem>>, %arg10: memref<3x5x2xf32, #tpu.memory_space<vmem>>, %arg11: memref<4x5x32xf32, #tpu.memory_space<vmem>>) attributes {dimension_semantics = [], scalar_prefetch = 0 : i64, scratch_operands = 0 : i64, tpu.core_type = #tpu.core_type<tc>} {
    %0 = tpu.iota {dimensions = array<i32: 1>} : vector<5x64xi32>
    %c32_i32 = arith.constant 32 : i32
    %1 = vector.broadcast %c32_i32 : i32 to vector<5x64xi32>
    %2 = arith.cmpi slt, %0, %1 : vector<5x64xi32>
    %c0 = arith.constant 0 : index
    %c0_0 = arith.constant 0 : index
    %3 = vector.load %arg2[%c0, %c0_0] : memref<2x64xf32, #tpu.memory_space<vmem>>, vector<2x64xf32>
    %c0_1 = arith.constant 0 : index
    %c0_2 = arith.constant 0 : index
    %4 = vector.load %arg4[%c0_1, %c0_2] : memref<1x64xf32, #tpu.memory_space<vmem>>, vector<1x64xf32>
    %c0_3 = arith.constant 0 : index
    %c0_4 = arith.constant 0 : index
    %c0_5 = arith.constant 0 : index
    %5 = vector.load %arg0[%c0_3, %c0_4, %c0_5] : memref<3x5x2xf32, #tpu.memory_space<vmem>>, vector<1x5x2xf32>
    %6 = vector.shape_cast %5 : vector<1x5x2xf32> to vector<5x2xf32>
    %cst = arith.constant dense<0.000000e+00> : vector<5x64xf32>
    %7 = tpu.matmul %6, %3, %cst {dimension_numbers = #tpu.dot_dimension_numbers<[1], [0], [0], [1], [0, 0, 1, 1], [], []>} : vector<5x2xf32>, vector<2x64xf32>, vector<5x64xf32> -> vector<5x64xf32>
    %8 = vector.broadcast %4 : vector<1x64xf32> to vector<5x64xf32>
    %9 = arith.addf %7, %8 : vector<5x64xf32>
    %c1 = arith.constant 1 : index
    %c0_6 = arith.constant 0 : index
    %c0_7 = arith.constant 0 : index
    %10 = vector.load %arg0[%c1, %c0_6, %c0_7] : memref<3x5x2xf32, #tpu.memory_space<vmem>>, vector<1x5x2xf32>
    %11 = vector.shape_cast %10 : vector<1x5x2xf32> to vector<5x2xf32>
    %cst_8 = arith.constant dense<0.000000e+00> : vector<5x64xf32>
    %12 = tpu.matmul %11, %3, %cst_8 {dimension_numbers = #tpu.dot_dimension_numbers<[1], [0], [0], [1], [0, 0, 1, 1], [], []>} : vector<5x2xf32>, vector<2x64xf32>, vector<5x64xf32> -> vector<5x64xf32>
    %13 = vector.broadcast %4 : vector<1x64xf32> to vector<5x64xf32>
    %14 = arith.addf %12, %13 : vector<5x64xf32>
    %c2 = arith.constant 2 : index
    %c0_9 = arith.constant 0 : index
    %c0_10 = arith.constant 0 : index
    %15 = vector.load %arg0[%c2, %c0_9, %c0_10] : memref<3x5x2xf32, #tpu.memory_space<vmem>>, vector<1x5x2xf32>
    %16 = vector.shape_cast %15 : vector<1x5x2xf32> to vector<5x2xf32>
    %cst_11 = arith.constant dense<0.000000e+00> : vector<5x64xf32>
    %17 = tpu.matmul %16, %3, %cst_11 {dimension_numbers = #tpu.dot_dimension_numbers<[1], [0], [0], [1], [0, 0, 1, 1], [], []>} : vector<5x2xf32>, vector<2x64xf32>, vector<5x64xf32> -> vector<5x64xf32>
    %18 = vector.broadcast %4 : vector<1x64xf32> to vector<5x64xf32>
    %19 = arith.addf %17, %18 : vector<5x64xf32>
    %c0_12 = arith.constant 0 : index
    %c0_13 = arith.constant 0 : index
    %20 = vector.load %arg3[%c0_12, %c0_13] : memref<64x64xf32, #tpu.memory_space<vmem>>, vector<64x64xf32>
    %c0_14 = arith.constant 0 : index
    %c0_15 = arith.constant 0 : index
    %c0_16 = arith.constant 0 : index
    %21 = vector.load %arg1[%c0_14, %c0_15, %c0_16] : memref<2x5x64xf32, #tpu.memory_space<vmem>>, vector<1x5x64xf32>
    %22 = vector.shape_cast %21 : vector<1x5x64xf32> to vector<5x64xf32>
    %23 = arith.select %2, %9, %19 : vector<5x64xi1>, vector<5x64xf32>
    %cst_17 = arith.constant dense<0.000000e+00> : vector<5x64xf32>
    %24 = tpu.matmul %22, %20, %cst_17 {dimension_numbers = #tpu.dot_dimension_numbers<[1], [0], [0], [1], [0, 0, 1, 1], [], []>} : vector<5x64xf32>, vector<64x64xf32>, vector<5x64xf32> -> vector<5x64xf32>
    %25 = arith.addf %23, %24 : vector<5x64xf32>
    %26 = math.tanh %25 : vector<5x64xf32>
    %27 = arith.select %2, %14, %14 : vector<5x64xi1>, vector<5x64xf32>
    %cst_18 = arith.constant dense<0.000000e+00> : vector<5x64xf32>
    %28 = tpu.matmul %26, %20, %cst_18 {dimension_numbers = #tpu.dot_dimension_numbers<[1], [0], [0], [1], [0, 0, 1, 1], [], []>} : vector<5x64xf32>, vector<64x64xf32>, vector<5x64xf32> -> vector<5x64xf32>
    %29 = arith.addf %27, %28 : vector<5x64xf32>
    %30 = math.tanh %29 : vector<5x64xf32>
    %31 = arith.select %2, %19, %9 : vector<5x64xi1>, vector<5x64xf32>
    %cst_19 = arith.constant dense<0.000000e+00> : vector<5x64xf32>
    %32 = tpu.matmul %30, %20, %cst_19 {dimension_numbers = #tpu.dot_dimension_numbers<[1], [0], [0], [1], [0, 0, 1, 1], [], []>} : vector<5x64xf32>, vector<64x64xf32>, vector<5x64xf32> -> vector<5x64xf32>
    %33 = arith.addf %31, %32 : vector<5x64xf32>
    %34 = math.tanh %33 : vector<5x64xf32>
    %35 = vector.extract_strided_slice %34 {offsets = [0, 0], sizes = [5, 32], strides = [1, 1]} : vector<5x64xf32> to vector<5x32xf32>
    %c0_20 = arith.constant 0 : index
    %c0_21 = arith.constant 0 : index
    %c0_22 = arith.constant 0 : index
    %36 = vector.load %arg11[%c0_20, %c0_21, %c0_22] : memref<4x5x32xf32, #tpu.memory_space<vmem>>, vector<1x5x32xf32>
    %37 = vector.shape_cast %36 : vector<1x5x32xf32> to vector<5x32xf32>
    %38 = vector.shape_cast %35 : vector<5x32xf32> to vector<1x5x32xf32>
    tpu.vector_store %arg11[%c0_20, %c0_21, %c0_22], %38 {strides = array<i32>} : memref<4x5x32xf32, #tpu.memory_space<vmem>>, vector<1x5x32xf32>,
    %39 = vector.extract_strided_slice %34 {offsets = [0, 32], sizes = [5, 32], strides = [1, 1]} : vector<5x64xf32> to vector<5x32xf32>
    %c1_23 = arith.constant 1 : index
    %c0_24 = arith.constant 0 : index
    %c0_25 = arith.constant 0 : index
    %40 = vector.load %arg11[%c1_23, %c0_24, %c0_25] : memref<4x5x32xf32, #tpu.memory_space<vmem>>, vector<1x5x32xf32>
    %41 = vector.shape_cast %40 : vector<1x5x32xf32> to vector<5x32xf32>
    %42 = vector.shape_cast %39 : vector<5x32xf32> to vector<1x5x32xf32>
    tpu.vector_store %arg11[%c1_23, %c0_24, %c0_25], %42 {strides = array<i32>} : memref<4x5x32xf32, #tpu.memory_space<vmem>>, vector<1x5x32xf32>,
    %43 = arith.select %2, %26, %34 : vector<5x64xi1>, vector<5x64xf32>
    %44 = arith.select %2, %30, %30 : vector<5x64xi1>, vector<5x64xf32>
    %45 = arith.select %2, %34, %26 : vector<5x64xi1>, vector<5x64xf32>
    %c0_26 = arith.constant 0 : index
    %c0_27 = arith.constant 0 : index
    %46 = vector.load %arg5[%c0_26, %c0_27] : memref<64x64xf32, #tpu.memory_space<vmem>>, vector<64x64xf32>
    %c0_28 = arith.constant 0 : index
    %c0_29 = arith.constant 0 : index
    %47 = vector.load %arg7[%c0_28, %c0_29] : memref<1x64xf32, #tpu.memory_space<vmem>>, vector<1x64xf32>
    %cst_30 = arith.constant dense<0.000000e+00> : vector<5x64xf32>
    %48 = tpu.matmul %43, %46, %cst_30 {dimension_numbers = #tpu.dot_dimension_numbers<[1], [0], [0], [1], [0, 0, 1, 1], [], []>} : vector<5x64xf32>, vector<64x64xf32>, vector<5x64xf32> -> vector<5x64xf32>
    %49 = vector.broadcast %47 : vector<1x64xf32> to vector<5x64xf32>
    %50 = arith.addf %48, %49 : vector<5x64xf32>
    %cst_31 = arith.constant dense<0.000000e+00> : vector<5x64xf32>
    %51 = tpu.matmul %44, %46, %cst_31 {dimension_numbers = #tpu.dot_dimension_numbers<[1], [0], [0], [1], [0, 0, 1, 1], [], []>} : vector<5x64xf32>, vector<64x64xf32>, vector<5x64xf32> -> vector<5x64xf32>
    %52 = vector.broadcast %47 : vector<1x64xf32> to vector<5x64xf32>
    %53 = arith.addf %51, %52 : vector<5x64xf32>
    %cst_32 = arith.constant dense<0.000000e+00> : vector<5x64xf32>
    %54 = tpu.matmul %45, %46, %cst_32 {dimension_numbers = #tpu.dot_dimension_numbers<[1], [0], [0], [1], [0, 0, 1, 1], [], []>} : vector<5x64xf32>, vector<64x64xf32>, vector<5x64xf32> -> vector<5x64xf32>
    %55 = vector.broadcast %47 : vector<1x64xf32> to vector<5x64xf32>
    %56 = arith.addf %54, %55 : vector<5x64xf32>
    %c0_33 = arith.constant 0 : index
    %c0_34 = arith.constant 0 : index
    %57 = vector.load %arg6[%c0_33, %c0_34] : memref<64x64xf32, #tpu.memory_space<vmem>>, vector<64x64xf32>
    %c1_35 = arith.constant 1 : index
    %c0_36 = arith.constant 0 : index
    %c0_37 = arith.constant 0 : index
    %58 = vector.load %arg1[%c1_35, %c0_36, %c0_37] : memref<2x5x64xf32, #tpu.memory_space<vmem>>, vector<1x5x64xf32>
    %59 = vector.shape_cast %58 : vector<1x5x64xf32> to vector<5x64xf32>
    %60 = arith.select %2, %50, %56 : vector<5x64xi1>, vector<5x64xf32>
    %cst_38 = arith.constant dense<0.000000e+00> : vector<5x64xf32>
    %61 = tpu.matmul %59, %57, %cst_38 {dimension_numbers = #tpu.dot_dimension_numbers<[1], [0], [0], [1], [0, 0, 1, 1], [], []>} : vector<5x64xf32>, vector<64x64xf32>, vector<5x64xf32> -> vector<5x64xf32>
    %62 = arith.addf %60, %61 : vector<5x64xf32>
    %63 = math.tanh %62 : vector<5x64xf32>
    %64 = arith.select %2, %53, %53 : vector<5x64xi1>, vector<5x64xf32>
    %cst_39 = arith.constant dense<0.000000e+00> : vector<5x64xf32>
    %65 = tpu.matmul %63, %57, %cst_39 {dimension_numbers = #tpu.dot_dimension_numbers<[1], [0], [0], [1], [0, 0, 1, 1], [], []>} : vector<5x64xf32>, vector<64x64xf32>, vector<5x64xf32> -> vector<5x64xf32>
    %66 = arith.addf %64, %65 : vector<5x64xf32>
    %67 = math.tanh %66 : vector<5x64xf32>
    %68 = arith.select %2, %56, %50 : vector<5x64xi1>, vector<5x64xf32>
    %cst_40 = arith.constant dense<0.000000e+00> : vector<5x64xf32>
    %69 = tpu.matmul %67, %57, %cst_40 {dimension_numbers = #tpu.dot_dimension_numbers<[1], [0], [0], [1], [0, 0, 1, 1], [], []>} : vector<5x64xf32>, vector<64x64xf32>, vector<5x64xf32> -> vector<5x64xf32>
    %70 = arith.addf %68, %69 : vector<5x64xf32>
    %71 = math.tanh %70 : vector<5x64xf32>
    %72 = vector.extract_strided_slice %71 {offsets = [0, 0], sizes = [5, 32], strides = [1, 1]} : vector<5x64xf32> to vector<5x32xf32>
    %c2_41 = arith.constant 2 : index
    %c0_42 = arith.constant 0 : index
    %c0_43 = arith.constant 0 : index
    %73 = vector.load %arg11[%c2_41, %c0_42, %c0_43] : memref<4x5x32xf32, #tpu.memory_space<vmem>>, vector<1x5x32xf32>
    %74 = vector.shape_cast %73 : vector<1x5x32xf32> to vector<5x32xf32>
    %75 = vector.shape_cast %72 : vector<5x32xf32> to vector<1x5x32xf32>
    tpu.vector_store %arg11[%c2_41, %c0_42, %c0_43], %75 {strides = array<i32>} : memref<4x5x32xf32, #tpu.memory_space<vmem>>, vector<1x5x32xf32>,
    %76 = vector.extract_strided_slice %71 {offsets = [0, 32], sizes = [5, 32], strides = [1, 1]} : vector<5x64xf32> to vector<5x32xf32>
    %c3 = arith.constant 3 : index
    %c0_44 = arith.constant 0 : index
    %c0_45 = arith.constant 0 : index
    %77 = vector.load %arg11[%c3, %c0_44, %c0_45] : memref<4x5x32xf32, #tpu.memory_space<vmem>>, vector<1x5x32xf32>
    %78 = vector.shape_cast %77 : vector<1x5x32xf32> to vector<5x32xf32>
    %79 = vector.shape_cast %76 : vector<5x32xf32> to vector<1x5x32xf32>
    tpu.vector_store %arg11[%c3, %c0_44, %c0_45], %79 {strides = array<i32>} : memref<4x5x32xf32, #tpu.memory_space<vmem>>, vector<1x5x32xf32>,
    %80 = arith.select %2, %63, %71 : vector<5x64xi1>, vector<5x64xf32>
    %81 = arith.select %2, %67, %67 : vector<5x64xi1>, vector<5x64xf32>
    %82 = arith.select %2, %71, %63 : vector<5x64xi1>, vector<5x64xf32>
    %c0_46 = arith.constant 0 : index
    %c0_47 = arith.constant 0 : index
    %83 = vector.load %arg8[%c0_46, %c0_47] : memref<64x2xf32, #tpu.memory_space<vmem>>, vector<64x2xf32>
    %c0_48 = arith.constant 0 : index
    %c0_49 = arith.constant 0 : index
    %84 = vector.load %arg9[%c0_48, %c0_49] : memref<1x2xf32, #tpu.memory_space<vmem>>, vector<1x2xf32>
    %cst_50 = arith.constant dense<0.000000e+00> : vector<5x2xf32>
    %85 = tpu.matmul %80, %83, %cst_50 {dimension_numbers = #tpu.dot_dimension_numbers<[1], [0], [0], [1], [0, 0, 1, 1], [], []>} : vector<5x64xf32>, vector<64x2xf32>, vector<5x2xf32> -> vector<5x2xf32>
    %86 = vector.broadcast %84 : vector<1x2xf32> to vector<5x2xf32>
    %87 = arith.addf %85, %86 : vector<5x2xf32>
    %cst_51 = arith.constant 0.000000e+00 : f32
    %88 = vector.broadcast %cst_51 : f32 to vector<5x2xf32>
    %89 = arith.maximumf %87, %88 : vector<5x2xf32>
    %c0_52 = arith.constant 0 : index
    %c0_53 = arith.constant 0 : index
    %c0_54 = arith.constant 0 : index
    %90 = vector.load %arg10[%c0_52, %c0_53, %c0_54] : memref<3x5x2xf32, #tpu.memory_space<vmem>>, vector<1x5x2xf32>
    %91 = vector.shape_cast %90 : vector<1x5x2xf32> to vector<5x2xf32>
    %92 = vector.shape_cast %89 : vector<5x2xf32> to vector<1x5x2xf32>
    tpu.vector_store %arg10[%c0_52, %c0_53, %c0_54], %92 {strides = array<i32>} : memref<3x5x2xf32, #tpu.memory_space<vmem>>, vector<1x5x2xf32>,
    %cst_55 = arith.constant dense<0.000000e+00> : vector<5x2xf32>
    %93 = tpu.matmul %81, %83, %cst_55 {dimension_numbers = #tpu.dot_dimension_numbers<[1], [0], [0], [1], [0, 0, 1, 1], [], []>} : vector<5x64xf32>, vector<64x2xf32>, vector<5x2xf32> -> vector<5x2xf32>
    %94 = vector.broadcast %84 : vector<1x2xf32> to vector<5x2xf32>
    %95 = arith.addf %93, %94 : vector<5x2xf32>
    %cst_56 = arith.constant 0.000000e+00 : f32
    %96 = vector.broadcast %cst_56 : f32 to vector<5x2xf32>
    %97 = arith.maximumf %95, %96 : vector<5x2xf32>
    %c1_57 = arith.constant 1 : index
    %c0_58 = arith.constant 0 : index
    %c0_59 = arith.constant 0 : index
    %98 = vector.load %arg10[%c1_57, %c0_58, %c0_59] : memref<3x5x2xf32, #tpu.memory_space<vmem>>, vector<1x5x2xf32>
    %99 = vector.shape_cast %98 : vector<1x5x2xf32> to vector<5x2xf32>
    %100 = vector.shape_cast %97 : vector<5x2xf32> to vector<1x5x2xf32>
    tpu.vector_store %arg10[%c1_57, %c0_58, %c0_59], %100 {strides = array<i32>} : memref<3x5x2xf32, #tpu.memory_space<vmem>>, vector<1x5x2xf32>,
    %cst_60 = arith.constant dense<0.000000e+00> : vector<5x2xf32>
    %101 = tpu.matmul %82, %83, %cst_60 {dimension_numbers = #tpu.dot_dimension_numbers<[1], [0], [0], [1], [0, 0, 1, 1], [], []>} : vector<5x64xf32>, vector<64x2xf32>, vector<5x2xf32> -> vector<5x2xf32>
    %102 = vector.broadcast %84 : vector<1x2xf32> to vector<5x2xf32>
    %103 = arith.addf %101, %102 : vector<5x2xf32>
    %cst_61 = arith.constant 0.000000e+00 : f32
    %104 = vector.broadcast %cst_61 : f32 to vector<5x2xf32>
    %105 = arith.maximumf %103, %104 : vector<5x2xf32>
    %c2_62 = arith.constant 2 : index
    %c0_63 = arith.constant 0 : index
    %c0_64 = arith.constant 0 : index
    %106 = vector.load %arg10[%c2_62, %c0_63, %c0_64] : memref<3x5x2xf32, #tpu.memory_space<vmem>>, vector<1x5x2xf32>
    %107 = vector.shape_cast %106 : vector<1x5x2xf32> to vector<5x2xf32>
    %108 = vector.shape_cast %105 : vector<5x2xf32> to vector<1x5x2xf32>
    tpu.vector_store %arg10[%c2_62, %c0_63, %c0_64], %108 {strides = array<i32>} : memref<3x5x2xf32, #tpu.memory_space<vmem>>, vector<1x5x2xf32>,
    return
  }
}

</mosaic_0001>

<bundles_post_ra>
// kernel: rnn_model_forward.1
= control target key start
LH: loop header
LB: loop body
LE: loop exit
PB: predicated region body
PF: predicated region fallthrough
CT: control target
= control target key end

     0   :  { %17 = vsyncpa [#allocation3], 0  ;;  %s2179_s0 = inlined_call_operand.vmem [shape: f32[3,5,2], index: 0, kind: input, shape index: {}]   ;;  %s2180_s1 = inlined_call_operand.vmem [shape: f32[2,5,64], index: 1, kind: input, shape index: {}]   ;;  %s2181_s2 = inlined_call_operand.vmem [shape: f32[2,64], index: 2, kind: input, shape index: {}]   ;;  %s2182_s3 = inlined_call_operand.vmem [shape: f32[64,64], index: 3, kind: input, shape index: {}]   ;;  %s2183_s4 = inlined_call_operand.vmem [shape: f32[1,64], index: 4, kind: input, shape index: {}]   ;;  %s2184_s5 = inlined_call_operand.hbm [shape: f32[64,64], index: 5, kind: input, shape index: {}]   ;;  %s2185_s6 = inlined_call_operand.hbm [shape: f32[64,64], index: 6, kind: input, shape index: {}]   ;;  %s2186_s7 = inlined_call_operand.vmem [shape: f32[1,64], index: 7, kind: input, shape index: {}]   ;;  %s2187_s8 = inlined_call_operand.vmem [shape: f32[64,2], index: 8, kind: input, shape index: {}]   ;;  %s2188_s9 = inlined_call_operand.vmem [shape: f32[1,2], index: 9, kind: input, shape index: {}]   ;;  %s2189_s10 = inlined_call_operand.vmem [shape: f32[3,5,2], index: 10, kind: output, shape index: {0}]   ;;  %s2190_s11 = inlined_call_operand.vmem [shape: f32[4,5,32], index: 11, kind: output, shape index: {1}]  }
   0x1   :  { %18 = vsyncpa [#allocation5], 0  ;;  %s1729_s17 = smov [#allocation2]  }
   0x2   :  { %s34_s18 = sshll.u32 %s1729_s17, 4  ;;  %s35_s18 = int_to_ptr.vmem [resolvable:$true] %s34_s18 }
   0x3   :  { %s1693_s19 = scalar_lea.vmem %s35_s18, 1024  ;;  %p1698_p1 = scmp.lt.s32.totalorder %s35_s18, %s35_s18 }
   0x4   :  { %p1694_p0 = scmp.ne.s32.totalorder %s35_s18, %s1693_s19  ;;  %p1699_p2 = scmp.lt.s32.totalorder %s1693_s19, %s1693_s19 }
   0x6   :  { %p1700_p3 = por %p1699_p2, %p1698_p1 }
   0x8   :  { %p1701_p4 = pnand %p1700_p3, %p1694_p0 }
   0xa   :  { %1704 = shalt.err (!%p1701_p4)
}
   0xb   :  { %s1730_s20 = smov 128   ;;  %s1731_s21 = smov 8  }
   0xc   :  { %40 = dma.hbm_to_vmem [thread:$0]  %s2184_s5, 1024, %s35_s18, [#allocation3], %s1730_s20, %s1730_s20, %s1731_s21  }
   0xd   :  { %s1732_s24 = smov [#allocation4]  }
   0xe   :  { %s46_s25 = sshll.u32 %s1732_s24, 4  ;;  %s47_s25 = int_to_ptr.vmem [resolvable:$true] %s46_s25 }
   0xf   :  { %s1713_s26 = scalar_lea.vmem %s47_s25, 1024  ;;  %p1718_p6 = scmp.lt.s32.totalorder %s47_s25, %s47_s25 }
  0x10   :  { %p1714_p5 = scmp.ne.s32.totalorder %s47_s25, %s1713_s26  ;;  %p1719_p7 = scmp.lt.s32.totalorder %s1713_s26, %s1713_s26 }
  0x12   :  { %p1720_p8 = por %p1719_p7, %p1718_p6 }
  0x14   :  { %p1721_p9 = pnand %p1720_p8, %p1714_p5 }
  0x16   :  { %1724 = shalt.err (!%p1721_p9)
}
  0x17   :  { %52 = dma.hbm_to_vmem [thread:$0]  %s2185_s6, 1024, %s47_s25, [#allocation5], %s1730_s20, %s1730_s20, %s1731_s21  }
  0x18   :  { %1725 = dma.done.wait [#allocation3], 1024  }
  0x19   :  { %1726 = vsyncadd [#allocation3], 4294966272 }
  0x1a   :  { %1727 = dma.done.wait [#allocation5], 1024  }
  0x1b   :  { %1728 = vsyncadd [#allocation5], 4294966272  ;;  %v1733_v0 = vmov 0.0   ;;  %vm1734_vm0 = vmmov 0   ;;  %vm81_vm1 = vcmask 1041408   ;;  %vm77_vm2 = vcmask 15360  }
  0x1c   :  { %1428 = vmatprep.subr.mxu1 %v1733_v0  ;;  %1430 = vmatprep.mubr.msk.f32.mxu1 %vm1734_vm0, %v1733_v0  ;;  %v68_v1 = vld [vmem:[%s2181_s2] sm:$0x3]  ;;  %v1283_v2 = vld [vmem:[%s2179_s0 + $0x8] sm:$0x1f]  ;;  %v312_v3 = vld [vmem:[%s2182_s3 + $0x38] sm:$0xff]  ;;  %vm315_vm3 = vcmask 523264   ;;  %v65_v14 = vlaneseq }
  0x1d   :  { %1423 = vmatprep.subr.mxu0 %v1733_v0  ;;  %1425 = vmatprep.mubr.msk.f32.mxu0 %vm1734_vm0, %v1733_v0  ;;  %v70_v4 = vld [vmem:[%s2179_s0] sm:$0x1f]  ;;  %v311_v5 = vld [vmem:[%s2182_s3 + $0x30] sm:$0xff]  ;;  %v310_v6 = vld [vmem:[%s2182_s3 + $0x28] sm:$0xff]  ;;  %vm542_vm5 = vcmask 258048   ;;  %vm1119_vm6 = vcmask 12288  }
  0x1e   :  { %1429 = vmatpush3.msk.msra.mxu1 %vm81_vm1, %v68_v1  ;;  %1424 = vmatpush3.msk.msra.mxu0 %vm81_vm1, %v68_v1  ;;  %v1286_v7 = vld [vmem:[%s2179_s0 + $0x10] sm:$0x1f]  ;;  %v309_v8 = vld [vmem:[%s2182_s3 + $0x20] sm:$0xff]  ;;  %v308_v9 = vld [vmem:[%s2182_s3 + $0x18] sm:$0xff]  ;;  %v1892_v19 = vand.u32 127, %v65_v14 }
  0x1f   :  { %1431 = vmatmul.mubr.msk.f32.vlgmr.msra.gmra.mxu1 %vm77_vm2, %v1283_v2  ;;  %1438 = vmatprep.subr.mxu1 %v1733_v0  ;;  %v307_v10 = vld [vmem:[%s2182_s3 + $0x10] sm:$0xff]  ;;  %v306_v11 = vld [vmem:[%s2182_s3 + $0x8] sm:$0xff]  ;;  %v305_v12 = vld [vmem:[%s2182_s3] sm:$0xff] }
  0x20   :  { %1439 = vmatpush3.msra.mxu1 %v312_v3  ;;  %1426 = vmatmul.mubr.msk.f32.vlgmr.msra.gmra.mxu0 %vm77_vm2, %v70_v4  ;;  %v313_v13 = vld [vmem:[%s2180_s1] sm:$0x1f]  ;;  %vm67_vm4 = vcmp.lt.s32.totalorder %v1892_v19, 32  ;;  %v1907_v32 = vld [vmem:[#allocation2 + $0x38] sm:$0xff]  ;;  %v1911_v33 = vld [vmem:[#allocation2 + $0x30] sm:$0xff] }
  0x21   :  { %1440 = vmatprep.subr.mxu1 %v1733_v0  ;;  %1433 = vmatprep.subr.mxu0 %v1733_v0  ;;  %v1280_v15 = vld [vmem:[%s2183_s4] ss:$0 sm:$0xff]  ;;  %v1914_v34 = vld [vmem:[#allocation2 + $0x28] sm:$0xff]  ;;  %v1922_v36 = vld [vmem:[#allocation2 + $0x18] sm:$0xff] }
  0x22   :  { %1441 = vmatpush3.msra.mxu1 %v311_v5  ;;  %1434 = vmatpush3.msk.msra.mxu0 %vm81_vm1, %v68_v1  ;;  %v1918_v35 = vld [vmem:[#allocation2 + $0x20] sm:$0xff]  ;;  %v1926_v37 = vld [vmem:[#allocation2 + $0x10] sm:$0xff]  ;;  %v1930_v38 = vld [vmem:[#allocation2 + $0x8] sm:$0xff] }
  0x23   :  { %1442 = vmatprep.subr.mxu1 %v1733_v0  ;;  %1435 = vmatprep.mubr.msk.f32.mxu0 %vm1734_vm0, %v1733_v0  ;;  %v1934_v39 = vld [vmem:[#allocation2] sm:$0xff]  ;;  %v1961_v44 = vld [vmem:[#allocation4 + $0x38] sm:$0xff]  ;;  %v1965_v45 = vld [vmem:[#allocation4 + $0x30] sm:$0xff] }
  0x24   :  { %1443 = vmatpush3.msra.mxu1 %v310_v6  ;;  %1436 = vmatmul.mubr.msk.f32.vlgmr.msra.gmra.mxu0 %vm77_vm2, %v1286_v7  ;;  %v1969_v46 = vld [vmem:[#allocation4 + $0x28] sm:$0xff]  ;;  %v1973_v47 = vld [vmem:[#allocation4 + $0x20] sm:$0xff]  ;;  %v1977_v48 = vld [vmem:[#allocation4 + $0x18] sm:$0xff] }
  0x25   :  { %1444 = vmatprep.subr.mxu1 %v1733_v0  ;;  %1454 = vmatprep.mubr.msk.f32.mxu1 %vm1734_vm0, %v1733_v0  ;;  %v1981_v49 = vld [vmem:[#allocation4 + $0x10] sm:$0xff]  ;;  %v1985_v50 = vld [vmem:[#allocation4 + $0x8] sm:$0xff]  ;;  %v1989_v51 = vld [vmem:[#allocation4] sm:$0xff] }
  0x26   :  { %1445 = vmatpush3.msra.mxu1 %v309_v8  ;;  %1457 = vmatprep.subr.mxu0 %v1733_v0  ;;  %v1297_v52 = vld [vmem:[%s2180_s1 + $0x8] sm:$0x1f]  ;;  %s1735_s1 = smov 96  }
  0x27   :  { %1446 = vmatprep.subr.mxu1 %v1733_v0  ;;  %1458 = vmatpush3.msra.mxu0 %v312_v3  ;;  %v2097_v14 = vld [vmem:[%s2187_s8 + $0x28] sm:$0xff] }
  0x28   :  { %1447 = vmatpush3.msra.mxu1 %v308_v9  ;;  %1459 = vmatprep.subr.mxu0 %v1733_v0 }
  0x29   :  { %1448 = vmatprep.subr.mxu1 %v1733_v0  ;;  %1460 = vmatpush3.msra.mxu0 %v311_v5 }
  0x2a   :  { %1449 = vmatpush3.msra.mxu1 %v307_v10  ;;  %1461 = vmatprep.subr.mxu0 %v1733_v0 }
  0x2b   :  { %1450 = vmatprep.subr.mxu1 %v1733_v0  ;;  %1462 = vmatpush3.msra.mxu0 %v310_v6 }
  0x2c   :  { %1451 = vmatpush3.msra.mxu1 %v306_v11  ;;  %1463 = vmatprep.subr.mxu0 %v1733_v0 }
  0x2d   :  { %1452 = vmatprep.subr.mxu1 %v1733_v0  ;;  %1464 = vmatpush3.msra.mxu0 %v309_v8 }
  0x2e   :  { %1453 = vmatpush3.msra.mxu1 %v305_v12  ;;  %1465 = vmatprep.subr.mxu0 %v1733_v0 }
  0x2f   :  { %1455 = vmatmul.mubr.msk.f32.vlgmr.msra.gmra.mxu1 %vm315_vm3, %v313_v13  ;;  %1466 = vmatpush3.msra.mxu0 %v308_v9  ;;  %v2091_v13 = vld [vmem:[%s2187_s8 + $0x30] sm:$0xff] }
  0x30   :  { %1467 = vmatprep.subr.mxu0 %v1733_v0  ;;  %1473 = vmatprep.mubr.msk.f32.mxu0 %vm1734_vm0, %v1733_v0 }
  0x31   :  { %1468 = vmatpush3.msra.mxu0 %v307_v10  ;;  %1476 = vmatprep.subr.mxu1 %v1733_v0 }
  0x32   :  { %1469 = vmatprep.subr.mxu0 %v1733_v0  ;;  %1477 = vmatpush3.msra.mxu1 %v312_v3  ;;  %v1293_v3 = vld [vmem:[%s2186_s7] ss:$0 sm:$0xff] }
  0x33   :  { %1470 = vmatpush3.msra.mxu0 %v306_v11  ;;  %1478 = vmatprep.subr.mxu1 %v1733_v0 }
  0x34   :  { %1471 = vmatprep.subr.mxu0 %v1733_v0  ;;  %1479 = vmatpush3.msra.mxu1 %v311_v5 }
  0x35   :  { %1472 = vmatpush3.msra.mxu0 %v305_v12  ;;  %1480 = vmatprep.subr.mxu1 %v1733_v0 }
  0x36   :  { %1481 = vmatpush3.msra.mxu1 %v310_v6  ;;  %1492 = vmatprep.mubr.msk.f32.mxu1 %vm1734_vm0, %v1733_v0 }
  0x37   :  { %1482 = vmatprep.subr.mxu1 %v1733_v0  ;;  %1495 = vmatprep.subr.mxu0 %v1733_v0 }
  0x38   :  { %1483 = vmatpush3.msra.mxu1 %v309_v8 }
  0x39   :  { %1484 = vmatprep.subr.mxu1 %v1733_v0 }
  0x3a   :  { %1485 = vmatpush3.msra.mxu1 %v308_v9 }
  0x3b   :  { %1486 = vmatprep.subr.mxu1 %v1733_v0 }
  0x3c   :  { %1487 = vmatpush3.msra.mxu1 %v307_v10 }
  0x3d   :  { %1488 = vmatprep.subr.mxu1 %v1733_v0 }
  0x3e   :  { %1489 = vmatpush3.msra.mxu1 %v306_v11 }
  0x3f   :  { %1490 = vmatprep.subr.mxu1 %v1733_v0 }
  0x40   :  { %1491 = vmatpush3.msra.mxu1 %v305_v12  ;;  %v1037_v12 = vld [vmem:[%s2187_s8 + $0x38] sm:$0xff] }
  0x41   :  { %1514 = vmatprep.subr.mxu1 %v1733_v0 }
  0xdf   :  { %v226_v16 = vpop.f32.mrf.mxu1 }
  0xe0   :  { %v227_v17 = vadd.f32 %v1280_v15, %v226_v16  ;;  %v151_v18 = vpop.f32.mrf.mxu0  ;;  %v1033_v16 = vld [vmem:[%s2187_s8 + $0x18] sm:$0xff] }
  0xe1   :  { %v1432_v20 = vpop.f32.mrf.mxu1  ;;  %v152_v22 = vadd.f32 %v1280_v15, %v151_v18  ;;  %v1031_v18 = vld [vmem:[%s2187_s8 + $0x8] sm:$0xff] }
  0xe2   :  { %v1427_v21 = vpop.f32.mrf.mxu0  ;;  %v1030_v20 = vld [vmem:[%s2187_s8] sm:$0xff] }
  0xe4   :  { %v301_v23 = vpop.f32.mrf.mxu0 }
  0xe5   :  { %v302_v24 = vadd.f32 %v1280_v15, %v301_v23  ;;  %v1034_v15 = vld [vmem:[%s2187_s8 + $0x20] sm:$0xff] }
  0xe6   :  { %v1437_v25 = vpop.f32.mrf.mxu0 }
  0xe7   :  { %v1897_v26 = vsel %vm67_vm4, %v302_v24, %v152_v22  ;;  %v314_v27 = vsel %vm67_vm4, %v152_v22, %v302_v24 }
  0xef   :  { %v385_v28 = vpop.f32.mrf.mxu1 }
  0xf0   :  { %v389_v29 = vadd.f32 %v385_v28, %v314_v27 }
  0xf1   :  { %v1456_v30 = vpop.f32.mrf.mxu1 }
  0xf2   :  { %1673 = vtanh.f32 %v389_v29  ;;  %v1303_v29 = vld [vmem:[%s2188_s9] ss:$0 sm:$0xff] }
  0xff   :  { %v1901_v31 = vpop.eup %1673 }
 0x100   :  { %1474 = vmatmul.mubr.msk.f32.vlgmr.msra.gmra.mxu0 %vm315_vm3, %v1901_v31 }
 0x101   :  { %1511 = vmatprep.mubr.msk.f32.mxu0 %vm1734_vm0, %v1733_v0  ;;  %1496 = vmatpush3.msra.mxu0 %v1907_v32 }
 0x102   :  { %1497 = vmatprep.subr.mxu0 %v1733_v0 }
 0x103   :  { %1498 = vmatpush3.msra.mxu0 %v1911_v33 }
 0x104   :  { %1499 = vmatprep.subr.mxu0 %v1733_v0 }
 0x105   :  { %1500 = vmatpush3.msra.mxu0 %v1914_v34 }
 0x106   :  { %1501 = vmatprep.subr.mxu0 %v1733_v0 }
 0x107   :  { %1502 = vmatpush3.msra.mxu0 %v1918_v35 }
 0x108   :  { %1503 = vmatprep.subr.mxu0 %v1733_v0 }
 0x109   :  { %1504 = vmatpush3.msra.mxu0 %v1922_v36 }
 0x10a   :  { %1505 = vmatprep.subr.mxu0 %v1733_v0 }
 0x10b   :  { %1506 = vmatpush3.msra.mxu0 %v1926_v37 }
 0x10c   :  { %1507 = vmatprep.subr.mxu0 %v1733_v0 }
 0x10d   :  { %1508 = vmatpush3.msra.mxu0 %v1930_v38 }
 0x10e   :  { %1509 = vmatprep.subr.mxu0 %v1733_v0 }
 0x10f   :  { %1510 = vmatpush3.msra.mxu0 %v1934_v39 }
 0x110   :  { %1533 = vmatprep.subr.mxu0 %v1733_v0 }
 0x1c0   :  { %v460_v40 = vpop.f32.mrf.mxu0 }
 0x1c1   :  { %v464_v41 = vadd.f32 %v460_v40, %v227_v17  ;;  %v1032_v17 = vld [vmem:[%s2187_s8 + $0x10] sm:$0xff] }
 0x1c2   :  { %v1475_v42 = vpop.f32.mrf.mxu0 }
 0x1c3   :  { %1675 = vtanh.f32 %v464_v41 }
 0x1d0   :  { %v1676_v43 = vpop.eup %1675 }
 0x1d1   :  { %1493 = vmatmul.mubr.msk.f32.vlgmr.msra.gmra.mxu1 %vm315_vm3, %v1676_v43 }
 0x1d2   :  { %1515 = vmatpush3.msra.mxu1 %v1907_v32  ;;  %1530 = vmatprep.mubr.msk.f32.mxu1 %vm1734_vm0, %v1733_v0 }
 0x1d3   :  { %1516 = vmatprep.subr.mxu1 %v1733_v0 }
 0x1d4   :  { %1517 = vmatpush3.msra.mxu1 %v1911_v33 }
 0x1d5   :  { %1518 = vmatprep.subr.mxu1 %v1733_v0 }
 0x1d6   :  { %1519 = vmatpush3.msra.mxu1 %v1914_v34 }
 0x1d7   :  { %1520 = vmatprep.subr.mxu1 %v1733_v0 }
 0x1d8   :  { %1521 = vmatpush3.msra.mxu1 %v1918_v35 }
 0x1d9   :  { %1522 = vmatprep.subr.mxu1 %v1733_v0 }
 0x1da   :  { %1523 = vmatpush3.msra.mxu1 %v1922_v36 }
 0x1db   :  { %1524 = vmatprep.subr.mxu1 %v1733_v0 }
 0x1dc   :  { %1525 = vmatpush3.msra.mxu1 %v1926_v37 }
 0x1dd   :  { %1526 = vmatprep.subr.mxu1 %v1733_v0 }
 0x1de   :  { %1527 = vmatpush3.msra.mxu1 %v1930_v38 }
 0x1df   :  { %1528 = vmatprep.subr.mxu1 %v1733_v0 }
 0x1e0   :  { %1529 = vmatpush3.msra.mxu1 %v1934_v39 }
 0x1e1   :  { %1531 = vmatmul.mubr.msk.f32.vlgmr.msra.gmra.mxu1 %vm315_vm3, %v1676_v43  ;;  %1552 = vmatprep.subr.mxu1 %v1733_v0 }
 0x1e2   :  { %1568 = vmatprep.mubr.msk.f32.mxu1 %vm1734_vm0, %v1733_v0  ;;  %1553 = vmatpush3.msra.mxu1 %v1961_v44 }
 0x1e3   :  { %1554 = vmatprep.subr.mxu1 %v1733_v0 }
 0x1e4   :  { %1555 = vmatpush3.msra.mxu1 %v1965_v45 }
 0x1e5   :  { %1556 = vmatprep.subr.mxu1 %v1733_v0 }
 0x1e6   :  { %1557 = vmatpush3.msra.mxu1 %v1969_v46 }
 0x1e7   :  { %1558 = vmatprep.subr.mxu1 %v1733_v0 }
 0x1e8   :  { %1559 = vmatpush3.msra.mxu1 %v1973_v47 }
 0x1e9   :  { %1560 = vmatprep.subr.mxu1 %v1733_v0 }
 0x1ea   :  { %1561 = vmatpush3.msra.mxu1 %v1977_v48 }
 0x1eb   :  { %1562 = vmatprep.subr.mxu1 %v1733_v0 }
 0x1ec   :  { %1563 = vmatpush3.msra.mxu1 %v1981_v49 }
 0x1ed   :  { %1564 = vmatprep.subr.mxu1 %v1733_v0 }
 0x1ee   :  { %1565 = vmatpush3.msra.mxu1 %v1985_v50 }
 0x1ef   :  { %1566 = vmatprep.subr.mxu1 %v1733_v0 }
 0x1f0   :  { %1567 = vmatpush3.msra.mxu1 %v1989_v51 }
 0x1f1   :  { %1569 = vmatmul.mubr.msk.f32.vlgmr.msra.gmra.mxu1 %vm315_vm3, %v1297_v52  ;;  %1590 = vmatprep.subr.mxu1 %v1733_v0 }
 0x1f2   :  { %1591 = vmatpush3.msra.mxu1 %v1961_v44  ;;  %1606 = vmatprep.mubr.msk.f32.mxu1 %vm1734_vm0, %v1733_v0 }
 0x1f3   :  { %1592 = vmatprep.subr.mxu1 %v1733_v0 }
 0x1f4   :  { %1593 = vmatpush3.msra.mxu1 %v1965_v45 }
 0x1f5   :  { %1594 = vmatprep.subr.mxu1 %v1733_v0 }
 0x1f6   :  { %1595 = vmatpush3.msra.mxu1 %v1969_v46 }
 0x1f7   :  { %1596 = vmatprep.subr.mxu1 %v1733_v0 }
 0x1f8   :  { %1597 = vmatpush3.msra.mxu1 %v1973_v47 }
 0x1f9   :  { %1598 = vmatprep.subr.mxu1 %v1733_v0 }
 0x1fa   :  { %1599 = vmatpush3.msra.mxu1 %v1977_v48 }
 0x1fb   :  { %1600 = vmatprep.subr.mxu1 %v1733_v0 }
 0x1fc   :  { %1601 = vmatpush3.msra.mxu1 %v1981_v49 }
 0x1fd   :  { %1602 = vmatprep.subr.mxu1 %v1733_v0 }
 0x1fe   :  { %1603 = vmatpush3.msra.mxu1 %v1985_v50 }
 0x1ff   :  { %1604 = vmatprep.subr.mxu1 %v1733_v0 }
 0x200   :  { %1605 = vmatpush3.msra.mxu1 %v1989_v51 }
 0x201   :  { %1628 = vmatprep.subr.mxu1 %v1733_v0 }
 0x291   :  { %v536_v53 = vpop.f32.mrf.mxu1 }
 0x292   :  { %v540_v54 = vadd.f32 %v536_v53, %v1897_v26 }
 0x293   :  { %v1494_v55 = vpop.f32.mrf.mxu1 }
 0x294   :  { %1677 = vtanh.f32 %v540_v54 }
 0x2a1   :  { %v1678_v56 = vpop.eup %1677  ;;  %v2016_v57 = vpop.f32.mrf.mxu1 }
 0x2a2   :  { %545 = vrot.lane.b32.xlu0 %v1678_v56, %s1735_s1  ;;  %v550_v58 = vsel %vm67_vm4, %v1901_v31, %v1678_v56  ;;  %543 = vst.msk [vmem:[%s2190_s11] sm:$0x1f] %vm542_vm5, %v1678_v56  ;;  %v551_v60 = vsel %vm67_vm4, %v1678_v56, %v1901_v31  ;;  %v707_v21 = vadd.f32 %v1293_v3, %v2016_v57 }
 0x2a3   :  { %v1532_v59 = vpop.f32.mrf.mxu1  ;;  %1512 = vmatmul.mubr.msk.f32.vlgmr.msra.gmra.mxu0 %vm315_vm3, %v550_v58 }
 0x2a4   :  { %1534 = vmatpush3.msra.mxu0 %v1907_v32  ;;  %1549 = vmatprep.mubr.msk.f32.mxu0 %vm1734_vm0, %v1733_v0 }
 0x2a5   :  { %1535 = vmatprep.subr.mxu0 %v1733_v0 }
 0x2a6   :  { %1536 = vmatpush3.msra.mxu0 %v1911_v33 }
 0x2a7   :  { %1537 = vmatprep.subr.mxu0 %v1733_v0 }
 0x2a8   :  { %1538 = vmatpush3.msra.mxu0 %v1914_v34 }
 0x2a9   :  { %1539 = vmatprep.subr.mxu0 %v1733_v0 }
 0x2aa   :  { %1540 = vmatpush3.msra.mxu0 %v1918_v35 }
 0x2ab   :  { %1541 = vmatprep.subr.mxu0 %v1733_v0 }
 0x2ac   :  { %1542 = vmatpush3.msra.mxu0 %v1922_v36 }
 0x2ad   :  { %1543 = vmatprep.subr.mxu0 %v1733_v0 }
 0x2ae   :  { %1544 = vmatpush3.msra.mxu0 %v1926_v37 }
 0x2af   :  { %1545 = vmatprep.subr.mxu0 %v1733_v0 }
 0x2b0   :  { %1546 = vmatpush3.msra.mxu0 %v1930_v38 }
 0x2b1   :  { %1547 = vmatprep.subr.mxu0 %v1733_v0  ;;  %v863_v61 = vpop.f32.mrf.mxu1 }
 0x2b2   :  { %1548 = vmatpush3.msra.mxu0 %v1934_v39 }
 0x2b3   :  { %1550 = vmatmul.mubr.msk.f32.vlgmr.msra.gmra.mxu0 %vm315_vm3, %v551_v60  ;;  %1571 = vmatprep.subr.mxu0 %v1733_v0  ;;  %v1570_v62 = vpop.f32.mrf.mxu1 }
 0x2b4   :  { %1572 = vmatpush3.msra.mxu0 %v1961_v44  ;;  %1587 = vmatprep.mubr.msk.f32.mxu0 %vm1734_vm0, %v1733_v0 }
 0x2b5   :  { %1573 = vmatprep.subr.mxu0 %v1733_v0 }
 0x2b6   :  { %1574 = vmatpush3.msra.mxu0 %v1965_v45 }
 0x2b7   :  { %1575 = vmatprep.subr.mxu0 %v1733_v0 }
 0x2b8   :  { %1576 = vmatpush3.msra.mxu0 %v1969_v46 }
 0x2b9   :  { %1577 = vmatprep.subr.mxu0 %v1733_v0 }
 0x2ba   :  { %1578 = vmatpush3.msra.mxu0 %v1973_v47 }
 0x2bb   :  { %1579 = vmatprep.subr.mxu0 %v1733_v0 }
 0x2bc   :  { %1580 = vmatpush3.msra.mxu0 %v1977_v48 }
 0x2bd   :  { %1581 = vmatprep.subr.mxu0 %v1733_v0 }
 0x2be   :  { %1582 = vmatpush3.msra.mxu0 %v1981_v49 }
 0x2bf   :  { %1583 = vmatprep.subr.mxu0 %v1733_v0 }
 0x2c0   :  { %1584 = vmatpush3.msra.mxu0 %v1985_v50 }
 0x2c1   :  { %1585 = vmatprep.subr.mxu0 %v1733_v0 }
 0x2c2   :  { %1586 = vmatpush3.msra.mxu0 %v1989_v51 }
 0x2c3   :  { %1609 = vmatprep.subr.mxu0 %v1733_v0 }
 0x314   :  { %v546_v63 = vpop.permute.xlu0 %545 }
 0x315   :  { %1292 = vst.msk [vmem:[%s2190_s11 + $0x8] sm:$0x1f] %vm542_vm5, %v546_v63 }
 0x363   :  { %v636_v1 = vpop.f32.mrf.mxu0 }
 0x364   :  { %v637_v5 = vadd.f32 %v1293_v3, %v636_v1 }
 0x365   :  { %v1513_v2 = vpop.f32.mrf.mxu0 }
 0x373   :  { %v779_v4 = vpop.f32.mrf.mxu0 }
 0x374   :  { %v780_v6 = vadd.f32 %v1293_v3, %v779_v4 }
 0x375   :  { %v1551_v7 = vpop.f32.mrf.mxu0 }
 0x376   :  { %v793_v8 = vsel %vm67_vm4, %v637_v5, %v780_v6  ;;  %v944_v9 = vsel %vm67_vm4, %v780_v6, %v637_v5 }
 0x377   :  { %v867_v10 = vadd.f32 %v863_v61, %v793_v8 }
 0x379   :  { %1679 = vtanh.f32 %v867_v10 }
 0x386   :  { %v2078_v11 = vpop.eup %1679 }
 0x387   :  { %1588 = vmatmul.mubr.msk.f32.vlgmr.msra.gmra.mxu0 %vm315_vm3, %v2078_v11 }
 0x388   :  { %1625 = vmatprep.mubr.msk.f32.mxu0 %vm1734_vm0, %v1733_v0  ;;  %1610 = vmatpush3.msra.mxu0 %v1037_v12 }
 0x389   :  { %1611 = vmatprep.subr.mxu0 %v1733_v0 }
 0x38a   :  { %1612 = vmatpush3.msra.mxu0 %v2091_v13 }
 0x38b   :  { %1613 = vmatprep.subr.mxu0 %v1733_v0 }
 0x38c   :  { %1614 = vmatpush3.msra.mxu0 %v2097_v14 }
 0x38d   :  { %1615 = vmatprep.subr.mxu0 %v1733_v0 }
 0x38e   :  { %1616 = vmatpush3.msra.mxu0 %v1034_v15 }
 0x38f   :  { %1617 = vmatprep.subr.mxu0 %v1733_v0 }
 0x390   :  { %1618 = vmatpush3.msra.mxu0 %v1033_v16 }
 0x391   :  { %1619 = vmatprep.subr.mxu0 %v1733_v0 }
 0x392   :  { %1620 = vmatpush3.msra.mxu0 %v1032_v17 }
 0x393   :  { %1621 = vmatprep.subr.mxu0 %v1733_v0 }
 0x394   :  { %1622 = vmatpush3.msra.mxu0 %v1031_v18 }
 0x395   :  { %1623 = vmatprep.subr.mxu0 %v1733_v0 }
 0x396   :  { %1624 = vmatpush3.msra.mxu0 %v1030_v20 }
 0x397   :  { %1647 = vmatprep.subr.mxu0 %v1733_v0 }
 0x447   :  { %v938_v22 = vpop.f32.mrf.mxu0 }
 0x448   :  { %v942_v23 = vadd.f32 %v938_v22, %v707_v21 }
 0x449   :  { %v1589_v24 = vpop.f32.mrf.mxu0 }
 0x44a   :  { %1681 = vtanh.f32 %v942_v23 }
 0x457   :  { %v1682_v25 = vpop.eup %1681 }
 0x458   :  { %1607 = vmatmul.mubr.msk.f32.vlgmr.msra.gmra.mxu1 %vm315_vm3, %v1682_v25 }
 0x459   :  { %1629 = vmatpush3.msra.mxu1 %v1037_v12  ;;  %1644 = vmatprep.mubr.msk.f32.mxu1 %vm1734_vm0, %v1733_v0 }
 0x45a   :  { %1630 = vmatprep.subr.mxu1 %v1733_v0 }
 0x45b   :  { %1631 = vmatpush3.msra.mxu1 %v2091_v13 }
 0x45c   :  { %1632 = vmatprep.subr.mxu1 %v1733_v0 }
 0x45d   :  { %1633 = vmatpush3.msra.mxu1 %v2097_v14 }
 0x45e   :  { %1634 = vmatprep.subr.mxu1 %v1733_v0 }
 0x45f   :  { %1635 = vmatpush3.msra.mxu1 %v1034_v15 }
 0x460   :  { %1636 = vmatprep.subr.mxu1 %v1733_v0 }
 0x461   :  { %1637 = vmatpush3.msra.mxu1 %v1033_v16 }
 0x462   :  { %1638 = vmatprep.subr.mxu1 %v1733_v0 }
 0x463   :  { %1639 = vmatpush3.msra.mxu1 %v1032_v17 }
 0x464   :  { %1640 = vmatprep.subr.mxu1 %v1733_v0 }
 0x465   :  { %1641 = vmatpush3.msra.mxu1 %v1031_v18 }
 0x466   :  { %1642 = vmatprep.subr.mxu1 %v1733_v0 }
 0x467   :  { %1643 = vmatpush3.msra.mxu1 %v1030_v20 }
 0x468   :  { %1645 = vmatmul.mubr.msk.f32.vlgmr.msra.gmra.mxu1 %vm315_vm3, %v1682_v25 }
 0x518   :  { %v1014_v26 = vpop.f32.mrf.mxu1 }
 0x519   :  { %v1018_v27 = vadd.f32 %v1014_v26, %v944_v9 }
 0x51a   :  { %v1608_v28 = vpop.f32.mrf.mxu1 }
 0x51b   :  { %1683 = vtanh.f32 %v1018_v27 }
 0x528   :  { %v1684_v30 = vpop.eup %1683  ;;  %v1187_v31 = vpop.f32.mrf.mxu1 }
 0x529   :  { %1301 = vst.msk [vmem:[%s2190_s11 + $0x10] sm:$0x1f] %vm542_vm5, %v1684_v30  ;;  %v1188_v32 = vadd.f32 %v1303_v29, %v1187_v31  ;;  %1023 = vrot.lane.b32.xlu0 %v1684_v30, %s1735_s1  ;;  %v1028_v33 = vsel %vm67_vm4, %v2078_v11, %v1684_v30  ;;  %v1029_v36 = vsel %vm67_vm4, %v1684_v30, %v2078_v11 }
 0x52a   :  { %v1646_v34 = vpop.f32.mrf.mxu1  ;;  %1626 = vmatmul.mubr.msk.f32.vlgmr.msra.gmra.mxu0 %vm315_vm3, %v1028_v33 }
 0x52b   :  { %v1191_v35 = vmax.f32 %v1188_v32, 0.0  ;;  %1648 = vmatpush3.msra.mxu0 %v1037_v12  ;;  %1663 = vmatprep.mubr.msk.f32.mxu0 %vm1734_vm0, %v1733_v0 }
 0x52c   :  { %1649 = vmatprep.subr.mxu0 %v1733_v0 }
 0x52d   :  { %1306 = vst.msk [vmem:[%s2189_s10 + $0x8] sm:$0x1f] %vm1119_vm6, %v1191_v35  ;;  %1650 = vmatpush3.msra.mxu0 %v2091_v13 }
 0x52e   :  { %1651 = vmatprep.subr.mxu0 %v1733_v0 }
 0x52f   :  { %1652 = vmatpush3.msra.mxu0 %v2097_v14 }
 0x530   :  { %1653 = vmatprep.subr.mxu0 %v1733_v0 }
 0x531   :  { %1654 = vmatpush3.msra.mxu0 %v1034_v15 }
 0x532   :  { %1655 = vmatprep.subr.mxu0 %v1733_v0 }
 0x533   :  { %1656 = vmatpush3.msra.mxu0 %v1033_v16 }
 0x534   :  { %1657 = vmatprep.subr.mxu0 %v1733_v0 }
 0x535   :  { %1658 = vmatpush3.msra.mxu0 %v1032_v17 }
 0x536   :  { %1659 = vmatprep.subr.mxu0 %v1733_v0 }
 0x537   :  { %1660 = vmatpush3.msra.mxu0 %v1031_v18 }
 0x538   :  { %1661 = vmatprep.subr.mxu0 %v1733_v0 }
 0x539   :  { %1662 = vmatpush3.msra.mxu0 %v1030_v20 }
 0x53a   :  { %1664 = vmatmul.mubr.msk.f32.vlgmr.msra.gmra.mxu0 %vm315_vm3, %v1029_v36 }
 0x59b   :  { %v1024_v37 = vpop.permute.xlu0 %1023 }
 0x59c   :  { %1302 = vst.msk [vmem:[%s2190_s11 + $0x18] sm:$0x1f] %vm542_vm5, %v1024_v37 }
 0x5ea   :  { %v1114_v38 = vpop.f32.mrf.mxu0 }
 0x5eb   :  { %v1115_v39 = vadd.f32 %v1303_v29, %v1114_v38 }
 0x5ec   :  { %v1627_v40 = vpop.f32.mrf.mxu0 }
 0x5ed   :  { %v1118_v41 = vmax.f32 %v1115_v39, 0.0 }
 0x5ef   :  { %1120 = vst.msk [vmem:[%s2189_s10] sm:$0x1f] %vm1119_vm6, %v1118_v41 }
 0x5fa   :  { %v1263_v0 = vpop.f32.mrf.mxu0 }
 0x5fb   :  { %v1264_v19 = vadd.f32 %v1303_v29, %v1263_v0 }
 0x5fc   :  { %v1665_v42 = vpop.f32.mrf.mxu0 }
 0x5fd   :  { %v1267_v43 = vmax.f32 %v1264_v19, 0.0 }
 0x5ff   :  { %1308 = vst.msk [vmem:[%s2189_s10 + $0x10] sm:$0x1f] %vm1119_vm6, %v1267_v43 }
 0x600   :  { %1278 = vsyncpa [#allocation3], 1 }
 0x601   :  { %1279 = vsyncpa [#allocation5], 1 }

</bundles_post_ra>
